<compile_context>
chip_gen: v7x
topology: tpu7x:2x2x1
jax: 0.10.0
libtpu: 0.0.40
codegen_flags: <defaults>
</compile_context>

<pallas_src>
import jax
import jax.numpy as jnp
from jax.experimental import pallas as pl
from jax.experimental.pallas import tpu as pltpu


def _mlp_decoder_kernel(h_ref, w1_ref, b1_ref, w2t_ref, b2_ref, out_ref):
    # h_ref: (tm, P*H) in the caller's dtype.  Cast to bf16 in VMEM (cheap VPU
    # pass) instead of a standalone XLA cast pass over HBM.
    h = h_ref[...].astype(w1_ref.dtype)
    # Layer 1 on the MXU with packed contraction: K = P*H, N_out = P*H2.
    z = jnp.dot(h, w1_ref[...], preferred_element_type=jnp.float32)
    z = z + b1_ref[...]
    z = z * jax.nn.sigmoid(z)                       # SiLU (EUP sigmoid + VPU mul)
    # Layer 2 emitted transposed (out^T = W2_blk^T @ z^T) via an A @ B^T
    # contraction so the output block is lane-dense along the (packed) row
    # axis: shape (P*OUT, tm) -- dense vst instead of masked partial stores.
    out_t = jax.lax.dot_general(
        w2t_ref[...], z.astype(w2t_ref.dtype),
        dimension_numbers=(((1,), (1,)), ((), ())),
        preferred_element_type=jnp.float32)
    out_ref[...] = (out_t + b2_ref[...]).astype(out_ref.dtype)


def _default_row_pack():
    """8-row packing fills the 256-wide MXU contraction on v6e/v7x; v5-family
    MXUs are 128 wide, so 4-row packing already saturates them."""
    try:
        kind = jax.devices()[0].device_kind.lower()
    except Exception:
        return 8
    if "v5" in kind:
        return 4
    return 8


def general_purpose_decoder(h_pred, x_pred, x, w1, b1, w2, b2, *,
                            block_rows=8192, row_pack=None):
    """GeneralPurposeDecoder(decoding='MLP', vector_method='diff').

    Returns (h_out [N, OUT] in h_pred.dtype, v = x_pred - x [N, 3]).

    Weights are intentionally quantized to bf16 (f32 accumulation) inside the
    kernel -- a ~1e-2-level deviation from the f32 PyTorch module.
    """
    N, H = h_pred.shape
    H2 = w1.shape[1]
    OUT = w2.shape[1]
    P = _default_row_pack() if row_pack is None else int(row_pack)

    # ---- row packing: free (bitcast) reshape when N % P == 0 ----------------
    # NOTE: when N % P != 0 we pad by < P rows; jnp.pad is still a copy pass,
    # so callers should P-align N to hit the zero-copy path.  The tile-level
    # tail is always handled by Pallas partial final blocks (never padded).
    h_in = h_pred
    n_p = pl.cdiv(N, P) * P
    if n_p != N:
        h_in = jnp.pad(h_in, ((0, n_p - N), (0, 0)))
    M = n_p // P
    h_packed = h_in.reshape(M, P * H)          # row-major -> no data movement

    # ---- block-diagonal weights (tiny, DMA'd once, resident in VMEM) --------
    io_dtype = jnp.bfloat16
    eye = jnp.eye(P, dtype=jnp.float32)
    w1_blk = jnp.kron(eye, w1.astype(jnp.float32)).astype(io_dtype)    # (P*H, P*H2)
    w2t_blk = jnp.kron(eye, w2.T.astype(jnp.float32)).astype(io_dtype) # (P*OUT, P*H2)
    b1_t = jnp.tile(b1.astype(jnp.float32), P).reshape(1, P * H2)
    b2_c = jnp.tile(b2.astype(jnp.float32), P).reshape(P * OUT, 1)

    # ---- tile size in super-rows (each super-row = P packed rows) -----------
    tm = max(128, (block_rows // P // 128) * 128)     # lane-dense output stores
    tm = min(tm, max(128, pl.cdiv(M, 128) * 128))     # don't overshoot tiny N
    grid = (pl.cdiv(M, tm),)                          # partial final block OK

    out_t = pl.pallas_call(
        _mlp_decoder_kernel,
        out_shape=jax.ShapeDtypeStruct((P * OUT, M), jnp.float32),
        grid_spec=pltpu.PrefetchScalarGridSpec(
            num_scalar_prefetch=0,
            grid=grid,
            in_specs=[
                pl.BlockSpec((tm, P * H), lambda i: (i, 0)),        # h (streamed)
                pl.BlockSpec((P * H, P * H2), lambda i: (0, 0)),    # W1 blockdiag
                pl.BlockSpec((1, P * H2), lambda i: (0, 0)),        # b1 (tiled)
                pl.BlockSpec((P * OUT, P * H2), lambda i: (0, 0)),  # W2^T blockdiag
                pl.BlockSpec((P * OUT, 1), lambda i: (0, 0)),       # b2 (tiled)
            ],
            out_specs=pl.BlockSpec((P * OUT, tm), lambda i: (0, i)),
        ),
        compiler_params=pltpu.CompilerParams(
            dimension_semantics=("parallel",)),
    )(h_packed, w1_blk, b1_t, w2t_blk, b2_c)

    # Unpack: (P*OUT, M) -> (M, P*OUT) -> (M*P, OUT); row n = m*P + p.
    h_out = out_t.T.reshape(M * P, OUT)[:N].astype(h_pred.dtype)

    # vector_method == 'diff': trivial elementwise op, fused by XLA outside
    # the kernel (keeps all Pallas DMA streams lane-dense and useful).
    v = x_pred - x
    return h_out, v


def _xavier_uniform(key, fan_in, fan_out, dtype=jnp.float32):
    limit = (6.0 / (fan_in + fan_out)) ** 0.5
    return jax.random.uniform(key, (fan_in, fan_out), dtype, -limit, limit)


def _reference(h_pred, x_pred, x, w1, b1, w2, b2):
    """Pure-JAX reference mirroring the kernel's mixed precision
    (bf16 operands, f32 accumulation)."""
    f32, bf16 = jnp.float32, jnp.bfloat16
    hp = jax.lax.Precision.HIGHEST
    h_q = h_pred.astype(bf16).astype(f32)
    w1_q = w1.astype(bf16).astype(f32)
    w2_q = w2.astype(bf16).astype(f32)
    z = jnp.dot(h_q, w1_q, precision=hp) + b1.astype(f32)
    z = z * jax.nn.sigmoid(z)
    h_ref = jnp.dot(z.astype(bf16).astype(f32), w2_q, precision=hp) + b2.astype(f32)
    return h_ref, x_pred - x


if __name__ == "__main__":
    HIDDEN = 32
    OUTPUT_DIM = 1

    key = jax.random.PRNGKey(0)
    k_h, k_xp, k_x, k_w1, k_w2, k_h2 = jax.random.split(key, 6)

    # reset_parameters(): xavier_uniform weights, zero biases.  Stored as
    # [in, out] so the kernel computes y = x @ W + b (== torch's x @ W.T + b).
    w1 = _xavier_uniform(k_w1, HIDDEN, HIDDEN // 2)
    b1 = jnp.zeros((HIDDEN // 2,), jnp.float32)
    w2 = _xavier_uniform(k_w2, HIDDEN // 2, OUTPUT_DIM)
    b2 = jnp.zeros((OUTPUT_DIM,), jnp.float32)

    # --- test 1: small N (multiple of 8 -> zero-copy pack), single grid step,
    #             partial final block (M=25 < tm=128) --------------------------
    N = 200
    h_pred = jax.random.normal(k_h, (N, HIDDEN), jnp.float32)
    x_pred = jax.random.normal(k_xp, (N, 3), jnp.float32)
    x = jax.random.normal(k_x, (N, 3), jnp.float32)

    h_ref, v_ref = _reference(h_pred, x_pred, x, w1, b1, w2, b2)
    h_out, v_out = general_purpose_decoder(h_pred, x_pred, x, w1, b1, w2, b2)
    jax.block_until_ready((h_out, v_out))
    assert h_out.shape == (N, OUTPUT_DIM) and v_out.shape == (N, 3)
    assert jnp.allclose(h_out, h_ref, atol=1e-2, rtol=1e-2)
    assert jnp.allclose(v_out, v_ref, atol=1e-6, rtol=1e-6)

    # --- test 2: larger N, multi-step grid (exercises streaming + "parallel") -
    N2 = 2048
    h2 = jax.random.normal(k_h2, (N2, HIDDEN), jnp.float32)
    xp2 = jnp.zeros((N2, 3), jnp.float32)
    x2 = jnp.ones((N2, 3), jnp.float32)
    h2_ref, v2_ref = _reference(h2, xp2, x2, w1, b1, w2, b2)
    h2_out, v2_out = general_purpose_decoder(h2, xp2, x2, w1, b1, w2, b2,
                                             block_rows=1024)
    jax.block_until_ready((h2_out, v2_out))
    assert jnp.allclose(h2_out, h2_ref, atol=1e-2, rtol=1e-2)
    assert jnp.allclose(v2_out, v2_ref, atol=1e-6, rtol=1e-6)

    # --- test 3: N not a multiple of P (pad fallback) + v5e-style 4-row pack --
    N3 = 203
    h3 = jax.random.normal(k_h, (N3, HIDDEN), jnp.float32)
    xp3 = jax.random.normal(k_xp, (N3, 3), jnp.float32)
    x3 = jax.random.normal(k_x, (N3, 3), jnp.float32)
    h3_ref, v3_ref = _reference(h3, xp3, x3, w1, b1, w2, b2)
    h3_out, v3_out = general_purpose_decoder(h3, xp3, x3, w1, b1, w2, b2,
                                             row_pack=4)
    jax.block_until_ready((h3_out, v3_out))
    assert h3_out.shape == (N3, OUTPUT_DIM)
    assert jnp.allclose(h3_out, h3_ref, atol=1e-2, rtol=1e-2)
    assert jnp.allclose(v3_out, v3_ref, atol=1e-6, rtol=1e-6)

    print("KERNEL_OK")
</pallas_src>

<mosaic_0001>
module attributes {stable_mosaic.version = 11 : i64} {
  func.func @_mlp_decoder_kernel(%arg0: i32, %arg1: memref<128x256xf32, #tpu.memory_space<vmem>>, %arg2: memref<256x128xbf16, #tpu.memory_space<vmem>>, %arg3: memref<1x128xf32, #tpu.memory_space<vmem>>, %arg4: memref<8x128xbf16, #tpu.memory_space<vmem>>, %arg5: memref<8x1xf32, #tpu.memory_space<vmem>>, %arg6: memref<8x128xf32, #tpu.memory_space<vmem>>) attributes {dimension_semantics = [#tpu.dimension_semantics<parallel>], iteration_bounds = array<i64: 1>, scalar_prefetch = 0 : i64, scratch_operands = 0 : i64, tpu.core_type = #tpu.core_type<tc>, window_params = [{transform_indices = @transform_0, window_bounds = array<i64: 128, 256>}, {pipeline_mode = #tpu.pipeline_mode<synchronous>, transform_indices = @transform_1, window_bounds = array<i64: 256, 128>}, {pipeline_mode = #tpu.pipeline_mode<synchronous>, transform_indices = @transform_2, window_bounds = array<i64: 1, 128>}, {pipeline_mode = #tpu.pipeline_mode<synchronous>, transform_indices = @transform_3, window_bounds = array<i64: 8, 128>}, {pipeline_mode = #tpu.pipeline_mode<synchronous>, transform_indices = @transform_4, window_bounds = array<i64: 8, 1>}, {transform_indices = @transform_5, window_bounds = array<i64: 8, 128>}]} {
    %c0 = arith.constant 0 : index
    %c0_0 = arith.constant 0 : index
    %0 = vector.load %arg1[%c0, %c0_0] : memref<128x256xf32, #tpu.memory_space<vmem>>, vector<128x256xf32>
    %1 = arith.truncf %0 : vector<128x256xf32> to vector<128x256xbf16>
    %c0_1 = arith.constant 0 : index
    %c0_2 = arith.constant 0 : index
    %2 = vector.load %arg2[%c0_1, %c0_2] : memref<256x128xbf16, #tpu.memory_space<vmem>>, vector<256x128xbf16>
    %cst = arith.constant dense<0.000000e+00> : vector<128x128xf32>
    %3 = tpu.matmul %1, %2, %cst {dimension_numbers = #tpu.dot_dimension_numbers<[1], [0], [0], [1], [0, 0, 1, 1], [], []>} : vector<128x256xbf16>, vector<256x128xbf16>, vector<128x128xf32> -> vector<128x128xf32>
    %c0_3 = arith.constant 0 : index
    %c0_4 = arith.constant 0 : index
    %4 = vector.load %arg3[%c0_3, %c0_4] : memref<1x128xf32, #tpu.memory_space<vmem>>, vector<1x128xf32>
    %5 = vector.broadcast %4 : vector<1x128xf32> to vector<128x128xf32>
    %6 = arith.addf %3, %5 : vector<128x128xf32>
    %7 = arith.negf %6 : vector<128x128xf32>
    %8 = math.exp %7 : vector<128x128xf32>
    %cst_5 = arith.constant 1.000000e+00 : f32
    %9 = vector.broadcast %cst_5 : f32 to vector<128x128xf32>
    %10 = arith.addf %9, %8 : vector<128x128xf32>
    %11 = arith.divf %9, %10 : vector<128x128xf32>
    %12 = arith.mulf %6, %11 : vector<128x128xf32>
    %c0_6 = arith.constant 0 : index
    %c0_7 = arith.constant 0 : index
    %13 = vector.load %arg4[%c0_6, %c0_7] : memref<8x128xbf16, #tpu.memory_space<vmem>>, vector<8x128xbf16>
    %14 = arith.truncf %12 : vector<128x128xf32> to vector<128x128xbf16>
    %cst_8 = arith.constant dense<0.000000e+00> : vector<8x128xf32>
    %15 = tpu.matmul %13, %14, %cst_8 {dimension_numbers = #tpu.dot_dimension_numbers<[1], [1], [0], [0], [0, 0, 1, 0], [], []>} : vector<8x128xbf16>, vector<128x128xbf16>, vector<8x128xf32> -> vector<8x128xf32>
    %c0_9 = arith.constant 0 : index
    %c0_10 = arith.constant 0 : index
    %16 = vector.load %arg5[%c0_9, %c0_10] : memref<8x1xf32, #tpu.memory_space<vmem>>, vector<8x1xf32>
    %17 = vector.broadcast %16 : vector<8x1xf32> to vector<8x128xf32>
    %18 = arith.addf %15, %17 : vector<8x128xf32>
    %c0_11 = arith.constant 0 : index
    %c0_12 = arith.constant 0 : index
    %19 = vector.load %arg6[%c0_11, %c0_12] : memref<8x128xf32, #tpu.memory_space<vmem>>, vector<8x128xf32>
    tpu.vector_store %arg6[%c0_11, %c0_12], %18 {strides = array<i32>} : memref<8x128xf32, #tpu.memory_space<vmem>>, vector<8x128xf32>,
    return
  }
  func.func @transform_0(%arg0: i32) -> (i32, i32) {
    %c0_i32 = arith.constant 0 : i32
    %c0_i32_0 = arith.constant 0 : i32
    return %arg0, %c0_i32 : i32, i32
  }
  func.func @transform_1(%arg0: i32) -> (i32, i32) {
    %c0_i32 = arith.constant 0 : i32
    %c0_i32_0 = arith.constant 0 : i32
    %c0_i32_1 = arith.constant 0 : i32
    return %c0_i32, %c0_i32_0 : i32, i32
  }
  func.func @transform_2(%arg0: i32) -> (i32, i32) {
    %c0_i32 = arith.constant 0 : i32
    %c0_i32_0 = arith.constant 0 : i32
    %c0_i32_1 = arith.constant 0 : i32
    return %c0_i32, %c0_i32_0 : i32, i32
  }
  func.func @transform_3(%arg0: i32) -> (i32, i32) {
    %c0_i32 = arith.constant 0 : i32
    %c0_i32_0 = arith.constant 0 : i32
    %c0_i32_1 = arith.constant 0 : i32
    return %c0_i32, %c0_i32_0 : i32, i32
  }
  func.func @transform_4(%arg0: i32) -> (i32, i32) {
    %c0_i32 = arith.constant 0 : i32
    %c0_i32_0 = arith.constant 0 : i32
    %c0_i32_1 = arith.constant 0 : i32
    return %c0_i32, %c0_i32_0 : i32, i32
  }
  func.func @transform_5(%arg0: i32) -> (i32, i32) {
    %c0_i32 = arith.constant 0 : i32
    %c0_i32_0 = arith.constant 0 : i32
    return %c0_i32, %arg0 : i32, i32
  }
}

</mosaic_0001>

<bundles_post_ra>
// kernel: tpu_custom_call.1
= control target key start
LH: loop header
LB: loop body
LE: loop exit
PB: predicated region body
PF: predicated region fallthrough
CT: control target
= control target key end

     0   :  { %10 = vsyncpa [#allocation3], 0  ;;  %s959_s0 = inlined_call_operand.hbm [shape: f32[25,256], index: 0, kind: input, shape index: {}]   ;;  %s960_s1 = inlined_call_operand.hbm [shape: bf16[256,128], index: 1, kind: input, shape index: {}]   ;;  %s961_s2 = inlined_call_operand.vmem [shape: f32[1,128], index: 2, kind: input, shape index: {}]   ;;  %s962_s3 = inlined_call_operand.vmem [shape: bf16[8,128], index: 3, kind: input, shape index: {}]   ;;  %s963_s4 = inlined_call_operand.vmem [shape: f32[8,1], index: 4, kind: input, shape index: {}]   ;;  %s964_s5 = inlined_call_operand.hbm [shape: f32[8,25], index: 5, kind: output, shape index: {}]  }
   0x1   :  { %11 = vsyncpa [#allocation6], 0 }
   0x2   :  { %12 = vsyncpa [#allocation4], 0 }
   0x3   :  { %17 = vsyncadd [#allocation3], 3072  ;;  %s803_s18 = smov [#allocation2]   ;;  %s731_s22 = scalar_lea.hbm %s959_s0, 1024 }
   0x4   :  { %s18_s19 = sshll.u32 %s803_s18, 4  ;;  %p732_p0 = scmp.ne.s32.totalorder %s959_s0, %s731_s22  ;;  %s19_s19 = int_to_ptr.vmem [resolvable:$true] %s18_s19 }
   0x5   :  { %p735_p1 = scmp.lt.u32.totalorder %s731_s22, %s959_s0 }
   0x7   :  { %p737_p2 = pnand %p735_p1, %p732_p0 }
   0x9   :  { %740 = shalt.err (!%p737_p2)
}
   0xa   :  { %s741_s27 = scalar_lea.vmem %s19_s19, 1024  ;;  %s745_s28 = scalar_lea.vmem %s19_s19, 4096 }
   0xb   :  { %p742_p3 = scmp.ne.s32.totalorder %s19_s19, %s741_s27  ;;  %p746_p4 = scmp.lt.s32.totalorder %s19_s19, %s19_s19 }
   0xc   :  { %p747_p5 = scmp.lt.s32.totalorder %s745_s28, %s741_s27 }
   0xe   :  { %p748_p6 = por %p747_p5, %p746_p4 }
  0x10   :  { %p749_p7 = pnand %p748_p6, %p742_p3 }
  0x12   :  { %752 = shalt.err (!%p749_p7)
}
  0x13   :  { %s804_s29 = smov 256   ;;  %s805_s30 = smov 16  }
  0x14   :  { %24 = dma.hbm_to_vmem [thread:$0]  %s959_s0, 1024, %s19_s19, [#allocation3], %s804_s29, %s804_s29, %s805_s30  }
  0x15   :  { %s806_s8 = smov [#allocation5]   ;;  %s753_s12 = scalar_lea.hbm %s960_s1, 2048 }
  0x16   :  { %s30_s9 = sshll.u32 %s806_s8, 4  ;;  %p754_p8 = scmp.ne.s32.totalorder %s960_s1, %s753_s12  ;;  %s31_s9 = int_to_ptr.vmem [resolvable:$true] %s30_s9 }
  0x17   :  { %p757_p9 = scmp.lt.u32.totalorder %s753_s12, %s960_s1 }
  0x19   :  { %p759_p10 = pnand %p757_p9, %p754_p8 }
  0x1b   :  { %762 = shalt.err (!%p759_p10)
}
  0x1c   :  { %s763_s17 = scalar_lea.vmem %s31_s9, 2048  ;;  %p768_p12 = scmp.lt.s32.totalorder %s31_s9, %s31_s9 }
  0x1d   :  { %p764_p11 = scmp.ne.s32.totalorder %s31_s9, %s763_s17  ;;  %p769_p13 = scmp.lt.s32.totalorder %s763_s17, %s763_s17 }
  0x1f   :  { %p770_p0 = por %p769_p13, %p768_p12 }
  0x21   :  { %p771_p1 = pnand %p770_p0, %p764_p11 }
  0x23   :  { %774 = shalt.err (!%p771_p1)
}
  0x24   :  { %s807_s0 = smov 64   ;;  %s808_s18 = smov 4  }
  0x25   :  { %36 = dma.hbm_to_vmem [thread:$0]  %s960_s1, 2048, %s31_s9, [#allocation6], %s807_s0, %s807_s0, %s808_s18  }
  0x26   :  { %797 = dma.done.wait [#allocation3], 4096  }
  0x27   :  { %798 = vsyncadd [#allocation3], 4294963200 }
  0x28   :  { %799 = dma.done.wait [#allocation6], 2048  }
  0x29   :  { %800 = vsyncadd [#allocation6], 4294965248  ;;  %v651_v0 = vld [vmem:[#allocation5 + $0x40] sm:$0xff]   ;;  %v653_v2 = vld [vmem:[#allocation5 + $0x48] sm:$0xff]   ;;  %vm810_vm0 = vmmov 0   ;;  %s812_s24 = smov [#allocation7]  }
  0x2a   :  { %v652_v1 = vld [vmem:[#allocation5] sm:$0xff]   ;;  %547 = vmatprep.subr.bf16.mxu0 %v651_v0  ;;  %v654_v3 = vld [vmem:[#allocation5 + $0x8] sm:$0xff]   ;;  %v655_v4 = vld [vmem:[#allocation5 + $0x50] sm:$0xff]   ;;  %v809_v0 = vmov 0.0   ;;  %s504_s25 = sshll.u32 %s812_s24, 4  ;;  %s505_s25 = int_to_ptr.vmem [resolvable:$true] %s504_s25 }
  0x2b   :  { %548 = vmatpush3.bf16.msra.mxu0 %v652_v1  ;;  %v656_v5 = vld [vmem:[#allocation5 + $0x10] sm:$0xff]   ;;  %v657_v6 = vld [vmem:[#allocation5 + $0x58] sm:$0xff]   ;;  %v659_v8 = vld [vmem:[#allocation5 + $0x60] sm:$0xff]   ;;  %620 = vmatprep.subr.bf16.mxu1 %v809_v0  ;;  %s775_s26 = scalar_lea.vmem %s505_s25, 128  ;;  %p780_p3 = scmp.lt.s32.totalorder %s505_s25, %s505_s25 }
  0x2c   :  { %549 = vmatprep.subr.bf16.mxu0 %v653_v2  ;;  %v658_v7 = vld [vmem:[#allocation5 + $0x18] sm:$0xff]   ;;  %v660_v9 = vld [vmem:[#allocation5 + $0x20] sm:$0xff]   ;;  %v661_v10 = vld [vmem:[#allocation5 + $0x68] sm:$0xff]   ;;  %636 = vmatprep.mubr.msk.bf16.mxu1 %vm810_vm0, %v809_v0  ;;  %v811_v2 = vmov 0   ;;  %p776_p2 = scmp.ne.s32.totalorder %s505_s25, %s775_s26  ;;  %p781_p4 = scmp.lt.s32.totalorder %s775_s26, %s775_s26 }
  0x2d   :  { %v51_v11 = vld [vmem:[#allocation2 + $0x8] sm:$0xff]  ;;  %v53_v12 = vld [vmem:[#allocation2 + $0x18] sm:$0xff]  ;;  %v663_v15 = vld [vmem:[#allocation5 + $0x70] sm:$0xff]   ;;  %650 = vset.pattern.permute.xlu0 %v811_v2 }
  0x2e   :  { %v83_v13 = vpack.c.bf16 %v53_v12, %v51_v11  ;;  %v662_v14 = vld [vmem:[#allocation5 + $0x28] sm:$0xff]   ;;  %v664_v16 = vld [vmem:[#allocation5 + $0x30] sm:$0xff]   ;;  %v665_v17 = vld [vmem:[#allocation5 + $0x78] sm:$0xff]   ;;  %p782_p5 = por %p781_p4, %p780_p3 }
  0x2f   :  { %550 = vmatpush3.bf16.msra.mxu0 %v654_v3  ;;  %v666_v18 = vld [vmem:[#allocation5 + $0x38] sm:$0xff]   ;;  %v50_v19 = vld [vmem:[#allocation2] sm:$0xff]  ;;  %v52_v20 = vld [vmem:[#allocation2 + $0x10] sm:$0xff] }
  0x30   :  { %551 = vmatprep.subr.bf16.mxu0 %v655_v4  ;;  %265 = vmatprep.mubr.bf16.mxu0 %v83_v13  ;;  %v55_v21 = vld [vmem:[#allocation2 + $0x28] sm:$0xff]  ;;  %v57_v22 = vld [vmem:[#allocation2 + $0x38] sm:$0xff]  ;;  %v82_v23 = vpack.c.bf16 %v52_v20, %v50_v19  ;;  %v54_v25 = vld [vmem:[#allocation2 + $0x20] sm:$0xff]  ;;  %p783_p6 = pnand %p782_p5, %p776_p2 }
  0x31   :  { %v85_v24 = vpack.c.bf16 %v57_v22, %v55_v21  ;;  %v56_v26 = vld [vmem:[#allocation2 + $0x30] sm:$0xff]  ;;  %v59_v27 = vld [vmem:[#allocation2 + $0x48] sm:$0xff]  ;;  %v61_v28 = vld [vmem:[#allocation2 + $0x58] sm:$0xff] }
  0x32   :  { %v84_v29 = vpack.c.bf16 %v56_v26, %v54_v25  ;;  %v87_v30 = vpack.c.bf16 %v61_v28, %v59_v27  ;;  %v58_v31 = vld [vmem:[#allocation2 + $0x40] sm:$0xff]  ;;  %v60_v32 = vld [vmem:[#allocation2 + $0x50] sm:$0xff]  ;;  %v63_v33 = vld [vmem:[#allocation2 + $0x68] sm:$0xff] }
  0x33   :  { %552 = vmatpush3.bf16.msra.mxu0 %v656_v5  ;;  %v65_v34 = vld [vmem:[#allocation2 + $0x78] sm:$0xff]  ;;  %v86_v35 = vpack.c.bf16 %v60_v32, %v58_v31  ;;  %v62_v37 = vld [vmem:[#allocation2 + $0x60] sm:$0xff]  ;;  %v64_v38 = vld [vmem:[#allocation2 + $0x70] sm:$0xff] }
  0x34   :  { %553 = vmatprep.subr.bf16.mxu0 %v657_v6  ;;  %v89_v36 = vpack.c.bf16 %v65_v34, %v63_v33  ;;  %v67_v39 = vld [vmem:[#allocation2 + $0x88] sm:$0xff]  ;;  %v69_v40 = vld [vmem:[#allocation2 + $0x98] sm:$0xff]  ;;  %v88_v41 = vpack.c.bf16 %v64_v38, %v62_v37  ;;  %v66_v43 = vld [vmem:[#allocation2 + $0x80] sm:$0xff] }
  0x35   :  { %v91_v42 = vpack.c.bf16 %v69_v40, %v67_v39  ;;  %v68_v44 = vld [vmem:[#allocation2 + $0x90] sm:$0xff]  ;;  %v71_v45 = vld [vmem:[#allocation2 + $0xa8] sm:$0xff]  ;;  %v73_v46 = vld [vmem:[#allocation2 + $0xb8] sm:$0xff] }
  0x36   :  { %v90_v47 = vpack.c.bf16 %v68_v44, %v66_v43  ;;  %v93_v48 = vpack.c.bf16 %v73_v46, %v71_v45  ;;  %v70_v49 = vld [vmem:[#allocation2 + $0xa0] sm:$0xff]  ;;  %v72_v50 = vld [vmem:[#allocation2 + $0xb0] sm:$0xff]  ;;  %v75_v51 = vld [vmem:[#allocation2 + $0xc8] sm:$0xff] }
  0x37   :  { %554 = vmatpush3.bf16.msra.mxu0 %v658_v7  ;;  %v77_v52 = vld [vmem:[#allocation2 + $0xd8] sm:$0xff]  ;;  %v92_v53 = vpack.c.bf16 %v72_v50, %v70_v49  ;;  %v74_v55 = vld [vmem:[#allocation2 + $0xc0] sm:$0xff]  ;;  %v76_v56 = vld [vmem:[#allocation2 + $0xd0] sm:$0xff] }
  0x38   :  { %555 = vmatprep.subr.bf16.mxu0 %v659_v8  ;;  %v95_v54 = vpack.c.bf16 %v77_v52, %v75_v51  ;;  %v79_v57 = vld [vmem:[#allocation2 + $0xe8] sm:$0xff]  ;;  %v81_v58 = vld [vmem:[#allocation2 + $0xf8] sm:$0xff]  ;;  %v94_v59 = vpack.c.bf16 %v76_v56, %v74_v55  ;;  %v78_v61 = vld [vmem:[#allocation2 + $0xe0] sm:$0xff] }
  0x39   :  { %v97_v60 = vpack.c.bf16 %v81_v58, %v79_v57  ;;  %v80_v62 = vld [vmem:[#allocation2 + $0xf0] sm:$0xff]  ;;  %v451_v1 = vld [vmem:[%s963_s4] sm:$0xff] }
  0x3a   :  { %v96_v63 = vpack.c.bf16 %v80_v62, %v78_v61  ;;  %454 = vperm.xlu0 %650, %v451_v1   ;;  %v875_v4 = vld [vmem:[%s961_s2] ss:$0 sm:$0xff] }
  0x3b   :  { %556 = vmatpush3.bf16.msra.mxu0 %v660_v9 }
  0x3c   :  { %557 = vmatprep.subr.bf16.mxu0 %v661_v10 }
  0x3f   :  { %558 = vmatpush3.bf16.msra.mxu0 %v662_v14 }
  0x40   :  { %559 = vmatprep.subr.bf16.mxu0 %v663_v15 }
  0x43   :  { %560 = vmatpush3.bf16.msra.mxu0 %v664_v16 }
  0x44   :  { %561 = vmatprep.subr.bf16.mxu0 %v665_v17 }
  0x47   :  { %562 = vmatpush3.bf16.msra.mxu0 %v666_v18 }
  0x4a   :  { %266 = vmatmul.mubr.bf16.vlgmr.msra.gmra.mrb[0].mxu0 %v82_v23 }
  0x4b   :  { %273 = vmatprep.mubr.bf16.mxu0 %v85_v24 }
  0x52   :  { %274 = vmatmul.mubr.bf16.gmra.mrb[4].mxu0 %v84_v29 }
  0x53   :  { %281 = vmatprep.mubr.bf16.mxu0 %v87_v30 }
  0x5a   :  { %282 = vmatmul.mubr.bf16.gmra.mrb[8].mxu0 %v86_v35 }
  0x5b   :  { %289 = vmatprep.mubr.bf16.mxu0 %v89_v36 }
  0x62   :  { %290 = vmatmul.mubr.bf16.gmra.mrb[12].mxu0 %v88_v41 }
  0x63   :  { %297 = vmatprep.mubr.bf16.mxu0 %v91_v42 }
  0x6a   :  { %298 = vmatmul.mubr.bf16.gmra.mrb[16].mxu0 %v90_v47 }
  0x6b   :  { %305 = vmatprep.mubr.bf16.mxu0 %v93_v48 }
  0x72   :  { %306 = vmatmul.mubr.bf16.gmra.mrb[20].mxu0 %v92_v53 }
  0x73   :  { %313 = vmatprep.mubr.bf16.mxu0 %v95_v54 }
  0x7a   :  { %314 = vmatmul.mubr.bf16.gmra.mrb[24].mxu0 %v94_v59 }
  0x7b   :  { %321 = vmatprep.mubr.bf16.mxu0 %v97_v60 }
  0x82   :  { %322 = vmatmul.mubr.bf16.gmra.mrb[28].mxu0 %v96_v63 }
 0x11d   :  { %v563_v3 = vpop.f32.mrb[0].mxu0 }
 0x11e   :  { %v564_v5 = vpop.f32.mrb[1].mxu0 }
 0x11f   :  { %v565_v6 = vadd.f32 %v564_v5, %v563_v3  ;;  %v566_v7 = vpop.f32.mrb[2].mxu0 }
 0x120   :  { %v567_v8 = vpop.f32.mrb[3].mxu0 }
 0x121   :  { %v268_v9 = vadd.f32 %v565_v6, %v875_v4  ;;  %v568_v10 = vadd.f32 %v567_v8, %v566_v7 }
 0x123   :  { %v531_v11 = vmul.f32 -1.442695, %v268_v9  ;;  %v271_v12 = vadd.f32 %v568_v10, %v875_v4 }
 0x125   :  { %667 = vpow2.f32 %v531_v11  ;;  %v532_v13 = vmul.f32 -1.442695, %v271_v12  ;;  %v569_v14 = vpop.f32.mrb[4].mxu0 }
 0x126   :  { %v570_v15 = vpop.f32.mrb[5].mxu0 }
 0x127   :  { %669 = vpow2.f32 %v532_v13  ;;  %v571_v16 = vadd.f32 %v570_v15, %v569_v14  ;;  %v572_v17 = vpop.f32.mrb[6].mxu0 }
 0x128   :  { %v573_v18 = vpop.f32.mrb[7].mxu0 }
 0x129   :  { %v880_v19 = vadd.f32 %v571_v16, %v875_v4  ;;  %v574_v20 = vadd.f32 %v573_v18, %v572_v17 }
 0x12b   :  { %v533_v21 = vmul.f32 -1.442695, %v880_v19  ;;  %v884_v22 = vadd.f32 %v574_v20, %v875_v4 }
 0x12d   :  { %671 = vpow2.f32 %v533_v21  ;;  %v534_v23 = vmul.f32 -1.442695, %v884_v22  ;;  %v575_v24 = vpop.f32.mrb[8].mxu0 }
 0x12e   :  { %v576_v25 = vpop.f32.mrb[9].mxu0 }
 0x12f   :  { %v668_v26 = vpop.eup %667  ;;  %673 = vpow2.f32 %v534_v23  ;;  %v577_v27 = vadd.f32 %v576_v25, %v575_v24  ;;  %v578_v28 = vpop.f32.mrb[10].mxu0 }
 0x130   :  { %v378_v29 = vadd.f32 1.0, %v668_v26  ;;  %v579_v30 = vpop.f32.mrb[11].mxu0 }
 0x131   :  { %v670_v31 = vpop.eup %669  ;;  %v888_v32 = vadd.f32 %v577_v27, %v875_v4  ;;  %v580_v33 = vadd.f32 %v579_v30, %v578_v28 }
 0x132   :  { %675 = vrcp.f32 %v378_v29  ;;  %v379_v34 = vadd.f32 1.0, %v670_v31 }
 0x133   :  { %v535_v35 = vmul.f32 -1.442695, %v888_v32  ;;  %v892_v36 = vadd.f32 %v580_v33, %v875_v4 }
 0x134   :  { %677 = vrcp.f32 %v379_v34 }
 0x135   :  { %679 = vpow2.f32 %v535_v35  ;;  %v536_v37 = vmul.f32 -1.442695, %v892_v36  ;;  %v581_v38 = vpop.f32.mrb[12].mxu0 }
 0x136   :  { %v582_v39 = vpop.f32.mrb[13].mxu0 }
 0x137   :  { %v672_v40 = vpop.eup %671  ;;  %681 = vpow2.f32 %v536_v37  ;;  %v583_v41 = vadd.f32 %v582_v39, %v581_v38  ;;  %v584_v42 = vpop.f32.mrb[14].mxu0 }
 0x138   :  { %v380_v43 = vadd.f32 1.0, %v672_v40  ;;  %v585_v44 = vpop.f32.mrb[15].mxu0 }
 0x139   :  { %v674_v45 = vpop.eup %673  ;;  %v896_v46 = vadd.f32 %v583_v41, %v875_v4  ;;  %v586_v47 = vadd.f32 %v585_v44, %v584_v42 }
 0x13a   :  { %683 = vrcp.f32 %v380_v43  ;;  %v381_v48 = vadd.f32 1.0, %v674_v45 }
 0x13b   :  { %v537_v49 = vmul.f32 -1.442695, %v896_v46  ;;  %v900_v50 = vadd.f32 %v586_v47, %v875_v4 }
 0x13c   :  { %v676_v51 = vpop.eup %675  ;;  %685 = vrcp.f32 %v381_v48 }
 0x13d   :  { %687 = vpow2.f32 %v537_v49  ;;  %v538_v52 = vmul.f32 -1.442695, %v900_v50  ;;  %v587_v53 = vpop.f32.mrb[16].mxu0  ;;  %v426_v59 = vmul.f32 %v676_v51, %v268_v9 }
 0x13e   :  { %v678_v54 = vpop.eup %677  ;;  %v588_v55 = vpop.f32.mrb[17].mxu0 }
 0x13f   :  { %v680_v56 = vpop.eup %679  ;;  %689 = vpow2.f32 %v538_v52  ;;  %v589_v57 = vadd.f32 %v588_v55, %v587_v53  ;;  %v590_v58 = vpop.f32.mrb[18].mxu0  ;;  %v427_v60 = vmul.f32 %v678_v54, %v271_v12 }
 0x140   :  { %v382_v61 = vadd.f32 1.0, %v680_v56  ;;  %v591_v62 = vpop.f32.mrb[19].mxu0 }
 0x141   :  { %v682_v63 = vpop.eup %681  ;;  %v904_v1 = vadd.f32 %v589_v57, %v875_v4  ;;  %v592_v2 = vadd.f32 %v591_v62, %v590_v58  ;;  %v443_v3 = vpack.c.bf16 %v427_v60, %v426_v59 }
 0x142   :  { %691 = vrcp.f32 %v382_v61  ;;  %v383_v5 = vadd.f32 1.0, %v682_v63 }
 0x143   :  { %v539_v6 = vmul.f32 -1.442695, %v904_v1  ;;  %v908_v7 = vadd.f32 %v592_v2, %v875_v4  ;;  %621 = vmatpush3.bf16.xpose.msra.mxu1 %v443_v3 }
 0x144   :  { %v684_v8 = vpop.eup %683  ;;  %693 = vrcp.f32 %v383_v5  ;;  %622 = vmatprep.subr.bf16.mxu1 %v809_v0 }
 0x145   :  { %695 = vpow2.f32 %v539_v6  ;;  %v540_v9 = vmul.f32 -1.442695, %v908_v7  ;;  %v593_v10 = vpop.f32.mrb[20].mxu0  ;;  %v428_v14 = vmul.f32 %v684_v8, %v880_v19 }
 0x146   :  { %v686_v11 = vpop.eup %685  ;;  %v594_v12 = vpop.f32.mrb[21].mxu0 }
 0x147   :  { %v688_v13 = vpop.eup %687  ;;  %v429_v15 = vmul.f32 %v686_v11, %v884_v22  ;;  %697 = vpow2.f32 %v540_v9  ;;  %v595_v16 = vadd.f32 %v594_v12, %v593_v10  ;;  %v596_v17 = vpop.f32.mrb[22].mxu0 }
 0x148   :  { %v384_v18 = vadd.f32 1.0, %v688_v13  ;;  %v597_v20 = vpop.f32.mrb[23].mxu0 }
 0x149   :  { %v690_v21 = vpop.eup %689  ;;  %v915_v23 = vadd.f32 %v595_v16, %v875_v4  ;;  %v598_v24 = vadd.f32 %v597_v20, %v596_v17  ;;  %v444_v25 = vpack.c.bf16 %v429_v15, %v428_v14 }
 0x14a   :  { %699 = vrcp.f32 %v384_v18  ;;  %v385_v26 = vadd.f32 1.0, %v690_v21 }
 0x14b   :  { %v541_v27 = vmul.f32 -1.442695, %v915_v23  ;;  %v919_v28 = vadd.f32 %v598_v24, %v875_v4  ;;  %623 = vmatpush3.bf16.xpose.msra.mxu1 %v444_v25 }
 0x14c   :  { %v692_v19 = vpop.eup %691  ;;  %701 = vrcp.f32 %v385_v26  ;;  %624 = vmatprep.subr.bf16.mxu1 %v809_v0 }
 0x14d   :  { %703 = vpow2.f32 %v541_v27  ;;  %v542_v22 = vmul.f32 -1.442695, %v919_v28  ;;  %v599_v29 = vpop.f32.mrb[24].mxu0  ;;  %v430_v34 = vmul.f32 %v692_v19, %v888_v32 }
 0x14e   :  { %v694_v30 = vpop.eup %693  ;;  %v600_v31 = vpop.f32.mrb[25].mxu0 }
 0x14f   :  { %v696_v33 = vpop.eup %695  ;;  %v431_v35 = vmul.f32 %v694_v30, %v892_v36  ;;  %705 = vpow2.f32 %v542_v22  ;;  %v601_v37 = vadd.f32 %v600_v31, %v599_v29  ;;  %v602_v38 = vpop.f32.mrb[26].mxu0  ;;  %v442_v31 = vld [vmem:[%s962_s3] sm:$0xf] }
 0x150   :  { %v386_v39 = vadd.f32 1.0, %v696_v33  ;;  %v603_v40 = vpop.f32.mrb[27].mxu0  ;;  %v455_v33 = vpop.permute.xlu0 %454 }
 0x151   :  { %v698_v41 = vpop.eup %697  ;;  %v926_v42 = vadd.f32 %v601_v37, %v875_v4  ;;  %v604_v43 = vadd.f32 %v603_v40, %v602_v38  ;;  %v445_v44 = vpack.c.bf16 %v431_v35, %v430_v34 }
 0x152   :  { %707 = vrcp.f32 %v386_v39  ;;  %v387_v45 = vadd.f32 1.0, %v698_v41 }
 0x153   :  { %v543_v47 = vmul.f32 -1.442695, %v926_v42  ;;  %v319_v48 = vadd.f32 %v604_v43, %v875_v4  ;;  %625 = vmatpush3.bf16.xpose.msra.mxu1 %v445_v44 }
 0x154   :  { %v700_v32 = vpop.eup %699  ;;  %709 = vrcp.f32 %v387_v45  ;;  %626 = vmatprep.subr.bf16.mxu1 %v809_v0 }
 0x155   :  { %711 = vpow2.f32 %v543_v47  ;;  %v544_v36 = vmul.f32 -1.442695, %v319_v48  ;;  %v605_v49 = vpop.f32.mrb[28].mxu0  ;;  %v432_v54 = vmul.f32 %v700_v32, %v896_v46 }
 0x156   :  { %v702_v51 = vpop.eup %701  ;;  %v606_v52 = vpop.f32.mrb[29].mxu0 }
 0x157   :  { %v704_v53 = vpop.eup %703  ;;  %v433_v55 = vmul.f32 %v702_v51, %v900_v50  ;;  %713 = vpow2.f32 %v544_v36  ;;  %v607_v56 = vadd.f32 %v606_v52, %v605_v49  ;;  %v608_v57 = vpop.f32.mrb[30].mxu0 }
 0x158   :  { %v388_v58 = vadd.f32 1.0, %v704_v53  ;;  %v609_v59 = vpop.f32.mrb[31].mxu0 }
 0x159   :  { %v706_v60 = vpop.eup %705  ;;  %v324_v61 = vadd.f32 %v607_v56, %v875_v4  ;;  %v610_v62 = vadd.f32 %v609_v59, %v608_v57  ;;  %v446_v63 = vpack.c.bf16 %v433_v55, %v432_v54 }
 0x15a   :  { %715 = vrcp.f32 %v388_v58  ;;  %v389_v2 = vadd.f32 1.0, %v706_v60 }
 0x15b   :  { %v545_v3 = vmul.f32 -1.442695, %v324_v61  ;;  %v327_v5 = vadd.f32 %v610_v62, %v875_v4  ;;  %627 = vmatpush3.bf16.xpose.msra.mxu1 %v446_v63 }
 0x15c   :  { %v708_v6 = vpop.eup %707  ;;  %717 = vrcp.f32 %v389_v2  ;;  %628 = vmatprep.subr.bf16.mxu1 %v809_v0 }
 0x15d   :  { %719 = vpow2.f32 %v545_v3  ;;  %v546_v46 = vmul.f32 -1.442695, %v327_v5  ;;  %v434_v9 = vmul.f32 %v708_v6, %v904_v1 }
 0x15e   :  { %v710_v50 = vpop.eup %709 }
 0x15f   :  { %v712_v8 = vpop.eup %711  ;;  %v435_v10 = vmul.f32 %v710_v50, %v908_v7  ;;  %721 = vpow2.f32 %v546_v46 }
 0x160   :  { %v390_v11 = vadd.f32 1.0, %v712_v8 }
 0x161   :  { %v714_v12 = vpop.eup %713  ;;  %v447_v13 = vpack.c.bf16 %v435_v10, %v434_v9 }
 0x162   :  { %723 = vrcp.f32 %v390_v11  ;;  %v391_v14 = vadd.f32 1.0, %v714_v12 }
 0x163   :  { %629 = vmatpush3.bf16.xpose.msra.mxu1 %v447_v13 }
 0x164   :  { %v716_v4 = vpop.eup %715  ;;  %725 = vrcp.f32 %v391_v14  ;;  %630 = vmatprep.subr.bf16.mxu1 %v809_v0 }
 0x165   :  { %v436_v17 = vmul.f32 %v716_v4, %v915_v23 }
 0x166   :  { %v718_v15 = vpop.eup %717 }
 0x167   :  { %v720_v16 = vpop.eup %719  ;;  %v437_v18 = vmul.f32 %v718_v15, %v919_v28 }
 0x168   :  { %v392_v1 = vadd.f32 1.0, %v720_v16 }
 0x169   :  { %v722_v20 = vpop.eup %721  ;;  %v448_v7 = vpack.c.bf16 %v437_v18, %v436_v17 }
 0x16a   :  { %727 = vrcp.f32 %v392_v1  ;;  %v393_v21 = vadd.f32 1.0, %v722_v20 }
 0x16b   :  { %631 = vmatpush3.bf16.xpose.msra.mxu1 %v448_v7 }
 0x16c   :  { %v724_v24 = vpop.eup %723  ;;  %729 = vrcp.f32 %v393_v21  ;;  %632 = vmatprep.subr.bf16.mxu1 %v809_v0 }
 0x16d   :  { %v438_v26 = vmul.f32 %v724_v24, %v926_v42 }
 0x16e   :  { %v726_v25 = vpop.eup %725 }
 0x16f   :  { %v439_v27 = vmul.f32 %v726_v25, %v319_v48 }
 0x171   :  { %v449_v19 = vpack.c.bf16 %v439_v27, %v438_v26 }
 0x173   :  { %633 = vmatpush3.bf16.xpose.msra.mxu1 %v449_v19 }
 0x174   :  { %v728_v22 = vpop.eup %727  ;;  %634 = vmatprep.subr.bf16.mxu1 %v809_v0 }
 0x175   :  { %v440_v28 = vmul.f32 %v728_v22, %v324_v61 }
 0x176   :  { %v730_v23 = vpop.eup %729 }
 0x177   :  { %v441_v29 = vmul.f32 %v730_v23, %v327_v5 }
 0x179   :  { %v450_v30 = vpack.c.bf16 %v441_v29, %v440_v28 }
 0x17b   :  { %635 = vmatpush3.bf16.xpose.msra.mxu1 %v450_v30 }
 0x182   :  { %637 = vmatmul.mubr.bf16.vlgmr.msra.gmra.mrb[0].mxu1 %v442_v31 }
 0x255   :  { %v491_v34 = vpop.f32.mrb[0].mxu1 }
 0x256   :  { %v492_v35 = vadd.f32 %v491_v34, %v455_v33  ;;  %v638_v37 = vpop.f32.mrb[1].mxu1 }
 0x257   :  { %v494_v38 = vpop.f32.mrb[2].mxu1 }
 0x258   :  { %497 = vst [vmem:[#allocation7] sm:$0xff] %v492_v35  ;;  %v639_v0 = vpop.f32.mrb[3].mxu1 }
 0x259   :  { %786 = shalt.err (!%p783_p6)
}
 0x25a   :  { %s787_s28 = scalar_lea.hbm %s964_s5, 128 }
 0x25b   :  { %p788_p7 = scmp.ne.s32.totalorder %s964_s5, %s787_s28  ;;  %p791_p8 = scmp.lt.u32.totalorder %s787_s28, %s964_s5 }
 0x25d   :  { %p793_p9 = pnand %p791_p8, %p788_p7 }
 0x25f   :  { %796 = shalt.err (!%p793_p9)
}
 0x260   :  { %507 = dma.vmem_to_hbm [thread:$0]  %s505_s25, 128, %s964_s5, [#allocation4]  }
 0x261   :  { %801 = dma.done.wait [#allocation4], 128  }
 0x262   :  { %802 = vsyncadd [#allocation4], 4294967168 }
 0x263   :  { %511 = vsyncpa [#allocation3], 1 }
 0x264   :  { %512 = vsyncpa [#allocation6], 1 }
 0x265   :  { %513 = vsyncpa [#allocation4], 1 }

</bundles_post_ra>
